<compile_context>
chip_gen: v7x
topology: tpu7x:2x2x1
jax: 0.10.0
libtpu: 0.0.40
codegen_flags: <defaults>
</compile_context>

<pallas_src>
import math

import jax
import jax.numpy as jnp
from jax.experimental import pallas as pl
from jax.experimental.pallas import tpu as pltpu

_SMEM = pltpu.MemorySpace.SMEM
_ON_TPU = jax.default_backend() == "tpu"


# ---------------------------------------------------------------------------
# in-kernel helpers
# ---------------------------------------------------------------------------
def _roll_lanes(x, shift, use_tpu_roll):
    """Static rotate along the lane (last) axis."""
    if use_tpu_roll:
        return pltpu.roll(x, shift, 1)        # XLU rotate (vector-extended slot)
    return jnp.roll(x, shift, axis=1)         # CPU-interpret / unaligned fallback


def _dilate_flat(seeds, W, block_size, use_tpu_roll):
    """block_size x block_size windowed max (block dilation) on a
    (rows, lane) flattened tile, lane = k*H*W.

    `seeds` is zero outside each image's valid (H-bs+1, W-bs+1) region, so
    every roll wrap-around (row seams, image seams, array end) sources a
    zero -> no masking needed.  Log2-doubling running maxima.
    """
    dropped = seeds
    for unit in (1, W):                       # along W, then along H (stride W)
        cover = 1
        while cover < block_size:
            s = min(cover, block_size - cover)
            dropped = jnp.maximum(
                dropped, _roll_lanes(dropped, s * unit, use_tpu_roll))
            cover += s
    return dropped


def _make_mask_kernel(*, rand_mode, tile_rows, n_rows, W, block_size,
                      use_tpu_roll):
    """Pass 1: per-tile keep-mask (int8) + exact per-tile keep count (int32).

    rand_mode:
      "hw"      - in-kernel hardware PRNG (TPU only), int32 threshold row.
      "bits"    - int32 random bits streamed from HBM, int32 threshold row.
      "uniform" - f32 U[0,1) noise streamed from HBM, f32 threshold row
                  (deterministic / testing path).
    """

    def kernel(*refs):
        if rand_mode == "hw":
            seed_ref, thr_ref, mask_ref, cnt_ref = refs
        else:
            thr_ref, rand_ref, mask_ref, cnt_ref = refs
        t = pl.program_id(0)
        lane = thr_ref.shape[1]

        if rand_mode == "hw":
            # Per-tile reseed -> bits independent of grid order / core split.
            pltpu.prng_seed(seed_ref[0] + t)
            raw = pltpu.prng_random_bits((tile_rows, lane))
            bits = raw if raw.dtype == jnp.int32 else pltpu.bitcast(raw, jnp.int32)
            rnd = bits & jnp.int32(0x7FFFFFFF)
        elif rand_mode == "bits":
            rnd = rand_ref[...] & jnp.int32(0x7FFFFFFF)
        else:                                  # "uniform"
            rnd = rand_ref[...]

        # Bernoulli(gamma) in a single compare: the threshold row folds gamma
        # and the (hm, wm) border (0 / -1 outside -> seed always 0 there).
        seeds = (rnd < thr_ref[...]).astype(jnp.float32)
        keep = jnp.float32(1.0) - _dilate_flat(seeds, W, block_size,
                                               use_tpu_roll)

        # Exact per-tile keep count (int32); mask off padded tail-tile rows.
        if n_rows % tile_rows:
            row = (jax.lax.broadcasted_iota(jnp.int32, (tile_rows, 1), 0)
                   + t * tile_rows)
            counted = jnp.where(row < n_rows, keep, jnp.float32(0.0))
        else:
            counted = keep
        cnt = jnp.sum(counted.astype(jnp.int32))

        r8 = jax.lax.broadcasted_iota(jnp.int32, (8, 128), 0)
        c8 = jax.lax.broadcasted_iota(jnp.int32, (8, 128), 1)
        cnt_ref[...] = jnp.where((r8 == 0) & (c8 == 0), cnt, jnp.int32(0))

        mask_ref[...] = keep.astype(jnp.int8)

    return kernel


def _apply_kernel(scale_ref, x_ref, mask_ref, o_ref):
    """Pass 2: out = mask * x * scale (lane-dense elementwise hot path)."""
    # TODO(synk): on v6e/v7x a bf16 x could stay in bf16 here; f32 math kept
    # so the global scale is applied at full precision on every generation.
    keep = mask_ref[...].astype(jnp.float32)
    o_ref[...] = (x_ref[...].astype(jnp.float32) * keep
                  * scale_ref[0]).astype(o_ref.dtype)


# ---------------------------------------------------------------------------
# tiling (generation aware)
# ---------------------------------------------------------------------------
def _vmem_budget():
    """(per-pass double-buffered working-set budget, vmem_limit_bytes)."""
    cap = 64 << 20                             # conservative: v7x physical / off-TPU
    if _ON_TPU:
        try:
            cap = int(pltpu.get_tpu_info().vmem_capacity_bytes)
        except Exception:                      # query unavailable on older jax
            pass
        if cap < (16 << 20):
            cap = 64 << 20
    ws_budget = min(cap // 3, 48 << 20)        # ~21 MiB on v7x, ~43 MiB on v5e/v6e
    vmem_limit = int(min(cap * 3 // 4, ws_budget + (16 << 20)))
    return ws_budget, vmem_limit


def _tile_rows_for(n_rows, lane, per_elem_bytes, ws_budget):
    """Rows of the (n_rows, lane) view per grid step for one pass."""
    rows = int(ws_budget // max(1, per_elem_bytes * lane))
    rows = max(1, min(rows, n_rows))
    if rows == n_rows:
        return rows                            # full dim: always a legal block
    if n_rows >= 32:
        return max(32, rows - rows % 32)       # int8 (32,128) packing friendly
    if n_rows >= 8:
        return max(8, rows - rows % 8)
    return n_rows


# ---------------------------------------------------------------------------
# public wrapper
# ---------------------------------------------------------------------------
def dropblock_pallas(x, gamma, *, block_size=3, seed=0, training=True,
                     noise=None, return_mask=False, apply_with_xla=False):
    """DropBlock forward (matches the PyTorch module's training semantics).

    x      : (B, C, H, W) activations.
    gamma  : Bernoulli drop probability (Python float).
    seed   : int seed for the Bernoulli bits (ignored if `noise` is given).
    noise  : optional (B, C, H, W) U[0,1) tensor; Bernoulli draw = noise < gamma
             (deterministic / testing path).
    apply_with_xla : skip the Pallas apply pass and let XLA fuse
             mask * x * scale with the surrounding graph.
    """
    if not training:                           # eval path: identity
        return (x, None) if return_mask else x

    B, C, H, W = x.shape
    if block_size > min(H, W):
        raise ValueError("block_size must be <= min(H, W)")
    bc, hw = B * C, H * W
    hm, wm = H - (block_size - 1), W - (block_size - 1)
    gamma = float(gamma)

    # ---- lane-dense packed view: (bc/k, k*hw), lane axis multiple of 128 ---
    k = 128 // math.gcd(hw, 128)
    if bc % k:
        # TODO(synk): pad B*C up to a multiple of k instead of falling back
        # to a masked-lane layout when it does not divide the packing factor.
        k = 1
    rows, lane = bc // k, k * hw
    x2 = x.reshape(rows, lane)
    use_tpu_roll = _ON_TPU and (lane % 128 == 0)

    # ---- threshold row: gamma and the (hm, wm) border folded together ------
    ri = jax.lax.broadcasted_iota(jnp.int32, (H, W), 0)
    ci = jax.lax.broadcasted_iota(jnp.int32, (H, W), 1)
    inside = ((ri < hm) & (ci < wm)).reshape(1, hw)

    if noise is not None:
        rand_mode = "uniform"
        rand2 = noise.reshape(rows, lane).astype(jnp.float32)
        thr_img = jnp.where(inside, jnp.float32(gamma), jnp.float32(-1.0))
    else:
        thr_i = min(max(int(round(gamma * 2147483648.0)), 0), 2147483647)
        thr_img = jnp.where(inside, jnp.int32(thr_i), jnp.int32(0))
        if _ON_TPU:
            rand_mode = "hw"                   # in-kernel hardware PRNG
            rand2 = None
        else:
            rand_mode = "bits"                 # portable fallback (CPU interpret)
            bits = jax.random.bits(jax.random.PRNGKey(seed), (rows, lane),
                                   dtype=jnp.uint32)
            rand2 = jax.lax.bitcast_convert_type(bits, jnp.int32)
    thr_row = jnp.tile(thr_img, (1, k))        # (1, lane), resident in VMEM

    ws_budget, vmem_limit = _vmem_budget()

    # ---- pass 1: block mask (int8) + per-tile int32 keep counts ------------
    rand_bytes = 0 if rand_mode == "hw" else 4
    # double-buffered (rand + int8 mask) tiles + ~3 live f32 temporaries/elem
    tile_rows1 = _tile_rows_for(rows, lane, 2 * (rand_bytes + 1) + 12, ws_budget)
    num_tiles1 = pl.cdiv(rows, tile_rows1)
    tile_spec1 = pl.BlockSpec((tile_rows1, lane), lambda t: (t, 0))

    in_specs = []
    args = []
    if rand_mode == "hw":
        in_specs.append(pl.BlockSpec(memory_space=_SMEM))            # seed
        args.append(jnp.full((1,), seed, dtype=jnp.int32))
    in_specs.append(pl.BlockSpec((1, lane), lambda t: (0, 0)))       # threshold
    args.append(thr_row)
    if rand_mode != "hw":
        in_specs.append(tile_spec1)                                  # rand tile
        args.append(rand2)

    mask8, partial = pl.pallas_call(
        _make_mask_kernel(rand_mode=rand_mode, tile_rows=tile_rows1,
                          n_rows=rows, W=W, block_size=block_size,
                          use_tpu_roll=use_tpu_roll),
        grid=(num_tiles1,),
        in_specs=in_specs,
        out_specs=(tile_spec1,
                   pl.BlockSpec((8, 128), lambda t: (t, 0))),
        out_shape=(jax.ShapeDtypeStruct((rows, lane), jnp.int8),
                   jax.ShapeDtypeStruct((num_tiles1 * 8, 128), jnp.int32)),
        compiler_params=pltpu.CompilerParams(
            dimension_semantics=("parallel",),       # v7x: both TensorCores
            vmem_limit_bytes=vmem_limit),
    )(*args)

    # exact global keep count (int32 partials reduced outside the kernel)
    count = jnp.sum(partial)
    count_m = float(bc * hw)                                     # countM
    scale = count_m / jnp.maximum(count.astype(jnp.float32),     # guard /0
                                  jnp.float32(1.0))

    # ---- pass 2: out = mask * x * scale -------------------------------------
    if apply_with_xla:
        # Trivial 2-input elementwise op: let XLA fuse it with the
        # producer/consumer of x instead of paying a pallas_call boundary.
        out2 = (x2.astype(jnp.float32) * mask8.astype(jnp.float32)
                * scale).astype(x.dtype)
    else:
        per_elem2 = 2 * (2 * x.dtype.itemsize + 1) + 4
        tile_rows2 = _tile_rows_for(rows, lane, per_elem2, ws_budget)
        num_tiles2 = pl.cdiv(rows, tile_rows2)
        tile_spec2 = pl.BlockSpec((tile_rows2, lane), lambda t: (t, 0))
        scale_arr = jnp.reshape(scale, (1,)).astype(jnp.float32)
        out2 = pl.pallas_call(
            _apply_kernel,
            grid=(num_tiles2,),
            in_specs=[pl.BlockSpec(memory_space=_SMEM),   # scale
                      tile_spec2,                         # x tile
                      tile_spec2],                        # int8 mask tile
            out_specs=tile_spec2,
            out_shape=jax.ShapeDtypeStruct((rows, lane), x.dtype),
            compiler_params=pltpu.CompilerParams(
                dimension_semantics=("parallel",),
                vmem_limit_bytes=vmem_limit),
        )(scale_arr, x2, mask8)

    out = out2.reshape(B, C, H, W)
    if return_mask:
        return out, mask8.reshape(B, C, H, W)
    return out


# ---------------------------------------------------------------------------
# pure-JAX reference (mirrors the torch scatter-based block mask)
# ---------------------------------------------------------------------------
def _dropblock_reference(x, gamma, u, *, block_size):
    B, C, H, W = x.shape
    hm, wm = H - block_size + 1, W - block_size + 1
    seeds = (u[:, :, :hm, :wm] < gamma).astype(jnp.float32)
    pooled = jnp.zeros((B, C, H, W), jnp.float32)
    for di in range(block_size):
        for dj in range(block_size):
            pooled = pooled.at[:, :, di:di + hm, dj:dj + wm].max(seeds)
    block_mask = 1.0 - pooled
    count_m = float(B * C * H * W)
    return block_mask * x * (count_m / jnp.maximum(jnp.sum(block_mask), 1.0))


if __name__ == "__main__":
    key = jax.random.PRNGKey(0)
    kx, ku, kx2, ku2 = jax.random.split(key, 4)

    B, C, H, W = 2, 4, 16, 16
    block_size = 3
    gamma = 0.1

    x = jax.random.normal(kx, (B, C, H, W), dtype=jnp.float32)

    # --- deterministic path: external uniform noise vs pure-JAX reference ---
    # TODO(synk): torch's Bernoulli RNG stream is not bit-reproducible in JAX;
    # the deterministic check thresholds jax.random noise in-kernel instead.
    u = jax.random.uniform(ku, (B, C, H, W), dtype=jnp.float32)
    out_det = dropblock_pallas(x, gamma, block_size=block_size, noise=u,
                               training=True)
    jax.block_until_ready(out_det)
    ref = _dropblock_reference(x, gamma, u, block_size=block_size)
    assert out_det.shape == x.shape and out_det.dtype == x.dtype
    assert jnp.allclose(out_det, ref, rtol=1e-5, atol=1e-5), \
        float(jnp.abs(out_det - ref).max())

    # XLA-fused apply variant matches the Pallas apply pass.
    out_xla = dropblock_pallas(x, gamma, block_size=block_size, noise=u,
                               training=True, apply_with_xla=True)
    assert jnp.allclose(out_xla, ref, rtol=1e-5, atol=1e-5)

    # --- lane-packed layout (H*W = 144 -> k = 8 images per lane row) --------
    xs = jax.random.normal(kx2, (2, 4, 12, 12), dtype=jnp.float32)
    us = jax.random.uniform(ku2, (2, 4, 12, 12), dtype=jnp.float32)
    out_s = dropblock_pallas(xs, gamma, block_size=block_size, noise=us,
                             training=True)
    ref_s = _dropblock_reference(xs, gamma, us, block_size=block_size)
    assert jnp.allclose(out_s, ref_s, rtol=1e-5, atol=1e-5), \
        float(jnp.abs(out_s - ref_s).max())

    # --- production path: in-kernel hw PRNG on TPU, jax.random bits off-TPU -
    out, keep8 = dropblock_pallas(x, gamma, block_size=block_size, seed=1234,
                                  training=True, return_mask=True)
    jax.block_until_ready(out)
    assert out.shape == x.shape and out.dtype == x.dtype
    keep = keep8.astype(jnp.float32)
    # keep-mask is binary
    assert bool(jnp.all((keep == 0.0) | (keep == 1.0)))
    # out == mask * x * (countM / count_ones) with the *global* count
    count_m = float(B * C * H * W)
    scale = count_m / max(float(jnp.sum(keep)), 1.0)
    assert jnp.allclose(out, keep * x * scale, rtol=1e-5, atol=1e-5)
    # dropped region is exactly a union of bs x bs blocks anchored in the
    # valid (H-bs+1, W-bs+1) region (morphological opening fixed point), i.e.
    # the flattened/packed dilation neither wrapped nor mis-anchored.
    dropped = 1.0 - keep
    hm, wm = H - block_size + 1, W - block_size + 1
    ero = jnp.ones((B, C, hm, wm), jnp.float32)
    for di in range(block_size):
        for dj in range(block_size):
            ero = jnp.minimum(ero, dropped[:, :, di:di + hm, dj:dj + wm])
    opened = jnp.zeros((B, C, H, W), jnp.float32)
    for di in range(block_size):
        for dj in range(block_size):
            opened = opened.at[:, :, di:di + hm, dj:dj + wm].max(ero)
    assert bool(jnp.all(opened == dropped))

    # --- eval path is identity ----------------------------------------------
    assert jnp.array_equal(
        dropblock_pallas(x, gamma, block_size=block_size, training=False), x)

    print("KERNEL_OK")
</pallas_src>

<mosaic_0001>
module attributes {stable_mosaic.version = 11 : i64} {
  func.func @kernel(%arg0: i32, %arg1: memref<1x256xf32, #tpu.memory_space<vmem>>, %arg2: memref<8x256xf32, #tpu.memory_space<vmem>>, %arg3: memref<8x256xi8, #tpu.memory_space<vmem>>, %arg4: memref<8x128xi32, #tpu.memory_space<vmem>>) attributes {dimension_semantics = [#tpu.dimension_semantics<parallel>], iteration_bounds = array<i64: 1>, scalar_prefetch = 0 : i64, scratch_operands = 0 : i64, tpu.core_type = #tpu.core_type<tc>, window_params = [{pipeline_mode = #tpu.pipeline_mode<synchronous>, transform_indices = @transform_0, window_bounds = array<i64: 1, 256>}, {transform_indices = @transform_1, window_bounds = array<i64: 8, 256>}, {transform_indices = @transform_2, window_bounds = array<i64: 8, 256>}, {transform_indices = @transform_3, window_bounds = array<i64: 8, 128>}]} {
    %c0 = arith.constant 0 : index
    %c0_0 = arith.constant 0 : index
    %0 = vector.load %arg2[%c0, %c0_0] : memref<8x256xf32, #tpu.memory_space<vmem>>, vector<8x256xf32>
    %c0_1 = arith.constant 0 : index
    %c0_2 = arith.constant 0 : index
    %1 = vector.load %arg1[%c0_1, %c0_2] : memref<1x256xf32, #tpu.memory_space<vmem>>, vector<1x256xf32>
    %2 = vector.broadcast %1 : vector<1x256xf32> to vector<8x256xf32>
    %3 = arith.cmpf olt, %0, %2 : vector<8x256xf32>
    %4 = arith.extui %3 : vector<8x256xi1> to vector<8x256xi32>
    %5 = arith.sitofp %4 : vector<8x256xi32> to vector<8x256xf32>
    %6 = vector.extract_strided_slice %5 {offsets = [0, 255], sizes = [8, 1], strides = [1, 1]} : vector<8x256xf32> to vector<8x1xf32>
    %7 = vector.extract_strided_slice %5 {offsets = [0, 0], sizes = [8, 255], strides = [1, 1]} : vector<8x256xf32> to vector<8x255xf32>
    %8 = tpu.concatenate %6, %7 in 1 : vector<8x1xf32>, vector<8x255xf32> -> vector<8x256xf32>
    %9 = arith.maximumf %5, %8 : vector<8x256xf32>
    %10 = vector.extract_strided_slice %9 {offsets = [0, 255], sizes = [8, 1], strides = [1, 1]} : vector<8x256xf32> to vector<8x1xf32>
    %11 = vector.extract_strided_slice %9 {offsets = [0, 0], sizes = [8, 255], strides = [1, 1]} : vector<8x256xf32> to vector<8x255xf32>
    %12 = tpu.concatenate %10, %11 in 1 : vector<8x1xf32>, vector<8x255xf32> -> vector<8x256xf32>
    %13 = arith.maximumf %9, %12 : vector<8x256xf32>
    %14 = vector.extract_strided_slice %13 {offsets = [0, 240], sizes = [8, 16], strides = [1, 1]} : vector<8x256xf32> to vector<8x16xf32>
    %15 = vector.extract_strided_slice %13 {offsets = [0, 0], sizes = [8, 240], strides = [1, 1]} : vector<8x256xf32> to vector<8x240xf32>
    %16 = tpu.concatenate %14, %15 in 1 : vector<8x16xf32>, vector<8x240xf32> -> vector<8x256xf32>
    %17 = arith.maximumf %13, %16 : vector<8x256xf32>
    %18 = vector.extract_strided_slice %17 {offsets = [0, 240], sizes = [8, 16], strides = [1, 1]} : vector<8x256xf32> to vector<8x16xf32>
    %19 = vector.extract_strided_slice %17 {offsets = [0, 0], sizes = [8, 240], strides = [1, 1]} : vector<8x256xf32> to vector<8x240xf32>
    %20 = tpu.concatenate %18, %19 in 1 : vector<8x16xf32>, vector<8x240xf32> -> vector<8x256xf32>
    %21 = arith.maximumf %17, %20 : vector<8x256xf32>
    %cst = arith.constant 1.000000e+00 : f32
    %22 = vector.broadcast %cst : f32 to vector<8x256xf32>
    %23 = arith.subf %22, %21 : vector<8x256xf32>
    %24 = arith.fptosi %23 : vector<8x256xf32> to vector<8x256xi32>
    %25 = vector.shape_cast %24 : vector<8x256xi32> to vector<1x8x256xi32>
    %cst_3 = arith.constant dense<0> : vector<1xi32>
    %26 = vector.multi_reduction <add>, %25, %cst_3 [1, 2] : vector<1x8x256xi32> to vector<1xi32>
    %27 = vector.shape_cast %26 : vector<1xi32> to vector<1x1x1xi32>
    %28 = vector.extract %27[0, 0, 0] : i32 from vector<1x1x1xi32>
    %29 = tpu.iota {dimensions = array<i32: 0>} : vector<8x128xi32>
    %30 = tpu.iota {dimensions = array<i32: 1>} : vector<8x128xi32>
    %c0_i32 = arith.constant 0 : i32
    %31 = vector.broadcast %c0_i32 : i32 to vector<8x128xi32>
    %32 = arith.cmpi eq, %29, %31 : vector<8x128xi32>
    %c0_i32_4 = arith.constant 0 : i32
    %33 = vector.broadcast %c0_i32_4 : i32 to vector<8x128xi32>
    %34 = arith.cmpi eq, %30, %33 : vector<8x128xi32>
    %35 = arith.andi %32, %34 : vector<8x128xi1>
    %c0_i32_5 = arith.constant 0 : i32
    %36 = vector.broadcast %28 : i32 to vector<8x128xi32>
    %37 = vector.broadcast %c0_i32_5 : i32 to vector<8x128xi32>
    %38 = arith.select %35, %36, %37 : vector<8x128xi1>, vector<8x128xi32>
    %c0_6 = arith.constant 0 : index
    %c0_7 = arith.constant 0 : index
    %39 = vector.load %arg4[%c0_6, %c0_7] : memref<8x128xi32, #tpu.memory_space<vmem>>, vector<8x128xi32>
    tpu.vector_store %arg4[%c0_6, %c0_7], %38 {strides = array<i32>} : memref<8x128xi32, #tpu.memory_space<vmem>>, vector<8x128xi32>,
    %40 = arith.fptosi %23 : vector<8x256xf32> to vector<8x256xi8>
    %c0_8 = arith.constant 0 : index
    %c0_9 = arith.constant 0 : index
    %41 = vector.load %arg3[%c0_8, %c0_9] : memref<8x256xi8, #tpu.memory_space<vmem>>, vector<8x256xi8>
    tpu.vector_store %arg3[%c0_8, %c0_9], %40 {strides = array<i32>} : memref<8x256xi8, #tpu.memory_space<vmem>>, vector<8x256xi8>,
    return
  }
  func.func @transform_0(%arg0: i32) -> (i32, i32) {
    %c0_i32 = arith.constant 0 : i32
    %c0_i32_0 = arith.constant 0 : i32
    %c0_i32_1 = arith.constant 0 : i32
    return %c0_i32, %c0_i32_0 : i32, i32
  }
  func.func @transform_1(%arg0: i32) -> (i32, i32) {
    %c0_i32 = arith.constant 0 : i32
    %c0_i32_0 = arith.constant 0 : i32
    return %arg0, %c0_i32 : i32, i32
  }
  func.func @transform_2(%arg0: i32) -> (i32, i32) {
    %c0_i32 = arith.constant 0 : i32
    %c0_i32_0 = arith.constant 0 : i32
    return %arg0, %c0_i32 : i32, i32
  }
  func.func @transform_3(%arg0: i32) -> (i32, i32) {
    %c0_i32 = arith.constant 0 : i32
    %c0_i32_0 = arith.constant 0 : i32
    return %arg0, %c0_i32 : i32, i32
  }
}

</mosaic_0001>

<bundles_post_ra>
// kernel: tpu_custom_call.1
= control target key start
LH: loop header
LB: loop body
LE: loop exit
PB: predicated region body
PF: predicated region fallthrough
CT: control target
= control target key end

     0   :  { %9 = vsyncpa [#allocation3], 0  ;;  %s409_s0 = inlined_call_operand.hbm [shape: f32[1,256], index: 0, kind: input, shape index: {}]   ;;  %s410_s1 = inlined_call_operand.hbm [shape: f32[8,256], index: 1, kind: input, shape index: {}]   ;;  %s411_s2 = inlined_call_operand.hbm [shape: s8[8,256], index: 2, kind: output, shape index: {0}]   ;;  %s412_s3 = inlined_call_operand.hbm [shape: s32[8,128], index: 3, kind: output, shape index: {1}]  }
   0x1   :  { %10 = vsyncpa [#allocation6], 0 }
   0x2   :  { %11 = vsyncpa [#allocation4], 0 }
   0x3   :  { %12 = vsyncpa [#allocation9], 0  ;;  %s327_s12 = smov [#allocation2]   ;;  %s328_s14 = smov [#allocation5]  }
   0x4   :  { %s19_s13 = sshll.u32 %s327_s12, 4  ;;  %s29_s15 = sshll.u32 %s328_s14, 4  ;;  %s20_s13 = int_to_ptr.vmem [resolvable:$true] %s19_s13  ;;  %s30_s15 = int_to_ptr.vmem [resolvable:$true] %s29_s15 }
   0x5   :  { %s231_s18 = scalar_lea.hbm %s409_s0, 32 }
   0x6   :  { %p232_p0 = scmp.ne.s32.totalorder %s409_s0, %s231_s18  ;;  %p235_p1 = scmp.lt.u32.totalorder %s231_s18, %s409_s0 }
   0x8   :  { %p237_p2 = pnand %p235_p1, %p232_p0 }
   0xa   :  { %240 = shalt.err (!%p237_p2)
}
   0xb   :  { %s241_s23 = scalar_lea.vmem %s20_s13, 32  ;;  %p246_p4 = scmp.lt.s32.totalorder %s20_s13, %s20_s13 }
   0xc   :  { %p242_p3 = scmp.ne.s32.totalorder %s20_s13, %s241_s23  ;;  %p247_p5 = scmp.lt.s32.totalorder %s241_s23, %s241_s23 }
   0xe   :  { %p248_p6 = por %p247_p5, %p246_p4 }
  0x10   :  { %p249_p7 = pnand %p248_p6, %p242_p3 }
  0x12   :  { %252 = shalt.err (!%p249_p7)
}
  0x13   :  { %22 = dma.hbm_to_vmem [thread:$0]  %s409_s0, 32, %s20_s13, [#allocation3]  }
  0x14   :  { %s253_s28 = scalar_lea.hbm %s410_s1, 256 }
  0x15   :  { %p254_p8 = scmp.ne.s32.totalorder %s410_s1, %s253_s28  ;;  %p257_p9 = scmp.lt.u32.totalorder %s253_s28, %s410_s1 }
  0x17   :  { %p259_p10 = pnand %p257_p9, %p254_p8 }
  0x19   :  { %262 = shalt.err (!%p259_p10)
}
  0x1a   :  { %s263_s6 = scalar_lea.vmem %s30_s15, 256  ;;  %p268_p12 = scmp.lt.s32.totalorder %s30_s15, %s30_s15 }
  0x1b   :  { %p264_p11 = scmp.ne.s32.totalorder %s30_s15, %s263_s6  ;;  %p269_p13 = scmp.lt.s32.totalorder %s263_s6, %s263_s6 }
  0x1d   :  { %p270_p0 = por %p269_p13, %p268_p12 }
  0x1f   :  { %p271_p1 = pnand %p270_p0, %p264_p11 }
  0x21   :  { %274 = shalt.err (!%p271_p1)
}
  0x22   :  { %32 = dma.hbm_to_vmem [thread:$0]  %s410_s1, 256, %s30_s15, [#allocation6]  }
  0x23   :  { %319 = dma.done.wait [#allocation3], 32  }
  0x24   :  { %320 = vsyncadd [#allocation3], 4294967264 }
  0x25   :  { %321 = dma.done.wait [#allocation6], 256  }
  0x26   :  { %322 = vsyncadd [#allocation6], 4294967040  ;;  %v43_v0 = vlaneseq  ;;  %v39_v4 = vld [vmem:[#allocation5] sm:$0xff]  ;;  %v40_v5 = vld [vmem:[#allocation5 + $0x8] sm:$0xff]  ;;  %v329_v9 = vmov 0.0   ;;  %s330_s1 = smov 1  }
  0x27   :  { %v41_v6 = vld [vmem:[#allocation2] sm:$0x3]  ;;  %vm66_vm2 = vcmask 7168   ;;  %s331_s8 = smov 16   ;;  %vm93_vm3 = vcmask 130048   ;;  %s332_s9 = smov [#allocation7]  }
  0x28   :  { %v379_v1 = vshrl.u32 %v43_v0, 7  ;;  %s172_s10 = sshll.u32 %s332_s9, 4  ;;  %s173_s10 = int_to_ptr.vmem [resolvable:$true] %s172_s10 }
  0x29   :  { %s275_s11 = scalar_lea.vmem %s173_s10, 64  ;;  %p280_p3 = scmp.lt.s32.totalorder %s173_s10, %s173_s10 }
  0x2a   :  { %v45_v2 = vsub.s32 0, %v379_v1  ;;  %v49_v3 = vsub.s32 1, %v379_v1  ;;  %p276_p2 = scmp.ne.s32.totalorder %s173_s10, %s275_s11  ;;  %p281_p4 = scmp.lt.s32.totalorder %s275_s11, %s275_s11 }
  0x2c   :  { %v46_v7 = vrot.slane %v41_v6, %v45_v2  ;;  %v50_v8 = vrot.slane %v41_v6, %v49_v3  ;;  %p282_p5 = por %p281_p4, %p280_p3 }
  0x2e   :  { %vm53_vm0 = vcmp.lt.f32.partialorder %v39_v4, %v46_v7  ;;  %vm54_vm1 = vcmp.lt.f32.partialorder %v40_v5, %v50_v8  ;;  %p283_p6 = pnand %p282_p5, %p276_p2 }
  0x2f   :  { %v196_v10 = vsel %vm53_vm0, 1.0, %v329_v9  ;;  %v197_v11 = vsel %vm54_vm1, 1.0, %v329_v9 }
  0x30   :  { %v211_v12 = vpack.i.bf16 %v196_v10, %v197_v11 }
  0x32   :  { %212 = vrot.lane.b32.xlu0 %v211_v12, %s330_s1 }
  0xa4   :  { %v213_v13 = vpop.permute.xlu0 %212 }
  0xa5   :  { %v215_v14 = vunpack.i.h.bf16 %v213_v13  ;;  %v214_v15 = vunpack.i.l.bf16 %v213_v13 }
  0xa7   :  { %v67_v16 = vsel %vm66_vm2, %v215_v14, %v214_v15  ;;  %v70_v17 = vsel %vm66_vm2, %v214_v15, %v215_v14 }
  0xa8   :  { %v71_v18 = vmax.f32 %v196_v10, %v70_v17  ;;  %v72_v19 = vmax.f32 %v197_v11, %v67_v16 }
  0xaa   :  { %v216_v20 = vpack.i.bf16 %v71_v18, %v72_v19 }
  0xac   :  { %217 = vrot.lane.b32.xlu0 %v216_v20, %s330_s1 }
 0x11e   :  { %v218_v21 = vpop.permute.xlu0 %217 }
 0x11f   :  { %v220_v22 = vunpack.i.h.bf16 %v218_v21  ;;  %v219_v23 = vunpack.i.l.bf16 %v218_v21 }
 0x121   :  { %v80_v24 = vsel %vm66_vm2, %v220_v22, %v219_v23  ;;  %v83_v25 = vsel %vm66_vm2, %v219_v23, %v220_v22 }
 0x122   :  { %v84_v26 = vmax.f32 %v71_v18, %v83_v25  ;;  %v85_v27 = vmax.f32 %v72_v19, %v80_v24 }
 0x124   :  { %v221_v28 = vpack.i.bf16 %v84_v26, %v85_v27 }
 0x126   :  { %222 = vrot.lane.b32.xlu1 %v221_v28, %s331_s8 }
 0x198   :  { %v223_v29 = vpop.permute.xlu1 %222 }
 0x199   :  { %v225_v30 = vunpack.i.h.bf16 %v223_v29  ;;  %v224_v31 = vunpack.i.l.bf16 %v223_v29 }
 0x19b   :  { %v94_v32 = vsel %vm93_vm3, %v225_v30, %v224_v31  ;;  %v97_v33 = vsel %vm93_vm3, %v224_v31, %v225_v30 }
 0x19c   :  { %v98_v34 = vmax.f32 %v84_v26, %v97_v33  ;;  %v99_v35 = vmax.f32 %v85_v27, %v94_v32 }
 0x19e   :  { %v226_v36 = vpack.i.bf16 %v98_v34, %v99_v35 }
 0x1a0   :  { %227 = vrot.lane.b32.xlu1 %v226_v36, %s331_s8 }
 0x212   :  { %v228_v37 = vpop.permute.xlu1 %227 }
 0x213   :  { %v230_v38 = vunpack.i.h.bf16 %v228_v37  ;;  %v229_v39 = vunpack.i.l.bf16 %v228_v37 }
 0x215   :  { %v107_v40 = vsel %vm93_vm3, %v230_v38, %v229_v39  ;;  %v110_v41 = vsel %vm93_vm3, %v229_v39, %v230_v38 }
 0x216   :  { %v111_v42 = vmax.f32 %v98_v34, %v110_v41  ;;  %v112_v43 = vmax.f32 %v99_v35, %v107_v40 }
 0x218   :  { %v113_v44 = vsub.f32 1.0, %v111_v42  ;;  %v114_v45 = vsub.f32 1.0, %v112_v43 }
 0x21a   :  { %v198_v46 = vtrunc.f32 %v113_v44  ;;  %v200_v47 = vtrunc.f32 %v114_v45 }
 0x21c   :  { %v199_v48 = vcvt.f32.s32 %v198_v46  ;;  %v201_v49 = vcvt.f32.s32 %v200_v47  ;;  %v149_v50 = vpack.c.f32.eXmY %v198_v46, %v198_v46, 312  ;;  %v155_v51 = vpack.c.f32.eXmY %v200_v47, %v200_v47, 312 }
 0x21e   :  { %v117_v52 = vadd.s32 %v201_v49, %v199_v48  ;;  %v153_v53 = vpack.c.b8 %v149_v50, %v149_v50  ;;  %v159_v54 = vpack.c.b8 %v155_v51, %v155_v51 }
 0x220   :  { %v119_v55 = vshrl.u32 %v117_v52, 16  ;;  %v118_v56 = vand.u32 65535, %v117_v52  ;;  %v161_v57 = vunpack.c.0.s8 %v153_v53  ;;  %v162_v58 = vunpack.c.0.s8 %v159_v54 }
 0x222   :  { %v121_v59 = vcvt.s32.f32 %v119_v55  ;;  %v120_v60 = vcvt.s32.f32 %v118_v56  ;;  %v163_v61 = vpack.c.b16 %v162_v58, %v161_v57 }
 0x224   :  { %124 = vadd.xlane.f32.xlu0 %v121_v59  ;;  %122 = vadd.xlane.f32.xlu1 %v120_v60  ;;  %v164_v62 = vpack.c.b8 %v163_v61, %v163_v61 }
 0x226   :  { %165 = vst [vmem:[#allocation7] sm:$0xf] %v164_v62 }
 0x227   :  { %286 = shalt.err (!%p283_p6)
}
 0x228   :  { %s287_s14 = scalar_lea.hbm %s411_s2, 64 }
 0x229   :  { %p288_p7 = scmp.ne.s32.totalorder %s411_s2, %s287_s14  ;;  %p291_p8 = scmp.lt.u32.totalorder %s287_s14, %s411_s2 }
 0x22b   :  { %p293_p9 = pnand %p291_p8, %p288_p7 }
 0x22d   :  { %296 = shalt.err (!%p293_p9)
}
 0x22e   :  { %175 = dma.vmem_to_hbm [thread:$0]  %s173_s10, 64, %s411_s2, [#allocation4]   ;;  %v140_v13 = vand.u32 127, %v43_v0  ;;  %vm141_vm4 = vcmp.eq.s32.totalorder %v379_v1, 0 }
 0x22f   :  { %s333_s21 = smov [#allocation8]  }
 0x230   :  { %vm142_vm5 = vcmp.eq.s32.totalorder %v140_v13, 0  ;;  %s182_s2 = sshll.u32 %s333_s21, 4  ;;  %s183_s2 = int_to_ptr.vmem [resolvable:$true] %s182_s2 }
 0x231   :  { %vm143_vm6 = vmand %vm141_vm4, %vm142_vm5  ;;  %s297_s23 = scalar_lea.vmem %s183_s2, 128  ;;  %p302_p11 = scmp.lt.s32.totalorder %s183_s2, %s183_s2 }
 0x232   :  { %p298_p10 = scmp.ne.s32.totalorder %s183_s2, %s297_s23  ;;  %p303_p12 = scmp.lt.s32.totalorder %s297_s23, %s297_s23 }
 0x234   :  { %p304_p13 = por %p303_p12, %p302_p11 }
 0x236   :  { %p305_p0 = pnand %p304_p13, %p298_p10 }
 0x2b1   :  { %v125_v63 = vpop.xlane.xlu0 %124  ;;  %v123_v2 = vpop.xlane.xlu1 %122 }
 0x2b2   :  { %v127_v3 = vcvt.f32.s32 %v125_v63  ;;  %v126_v5 = vcvt.f32.s32 %v123_v2 }
 0x2b4   :  { %v128_v4 = vshll.u32 %v127_v3, 16 }
 0x2b6   :  { %v129_v6 = vadd.s32 %v128_v4, %v126_v5 }
 0x2b8   :  { %v130_v7 = vrot.slane %v129_v6, 4 }
 0x2ba   :  { %v131_v8 = vadd.s32 %v130_v7, %v129_v6 }
 0x2bc   :  { %v132_v9 = vrot.slane %v131_v8, 2 }
 0x2be   :  { %v133_v10 = vadd.s32 %v132_v9, %v131_v8 }
 0x2c0   :  { %v134_v11 = vrot.slane %v133_v10, 1 }
 0x2c2   :  { %v135_v12 = vadd.s32 %v134_v11, %v133_v10 }
 0x2c4   :  { %202 = vpush %v135_v12 }
 0x2f5   :  { %s203_s22 = spop %202 }
 0x2f6   :  { %v144_v14 = vstv %s203_s22 }
 0x2f7   :  { %v145_v15 = vsel %vm143_vm6, %v144_v14, 0 }
 0x2f8   :  { %146 = vst [vmem:[#allocation8] sm:$0xff] %v145_v15 }
 0x2f9   :  { %308 = shalt.err (!%p305_p0)
}
 0x2fa   :  { %s309_s26 = scalar_lea.hbm %s412_s3, 128 }
 0x2fb   :  { %p310_p1 = scmp.ne.s32.totalorder %s412_s3, %s309_s26  ;;  %p313_p2 = scmp.lt.u32.totalorder %s309_s26, %s412_s3 }
 0x2fd   :  { %p315_p3 = pnand %p313_p2, %p310_p1 }
 0x2ff   :  { %318 = shalt.err (!%p315_p3)
}
 0x300   :  { %185 = dma.vmem_to_hbm [thread:$0]  %s183_s2, 128, %s412_s3, [#allocation9]  }
 0x301   :  { %323 = dma.done.wait [#allocation4], 64  }
 0x302   :  { %324 = vsyncadd [#allocation4], 4294967232 }
 0x303   :  { %325 = dma.done.wait [#allocation9], 128  }
 0x304   :  { %326 = vsyncadd [#allocation9], 4294967168 }
 0x305   :  { %192 = vsyncpa [#allocation3], 1 }
 0x306   :  { %193 = vsyncpa [#allocation6], 1 }
 0x307   :  { %194 = vsyncpa [#allocation4], 1 }
 0x308   :  { %195 = vsyncpa [#allocation9], 1 }

</bundles_post_ra>
